<compile_context>
chip_gen: v6e
topology: v6e:2x2x1
jax: 0.10.0
libtpu: 0.0.40
codegen_flags: <defaults>
</compile_context>

<pallas_src>
import jax
import jax.numpy as jnp
from jax.experimental import pallas as pl
from jax.experimental.pallas import tpu as pltpu


def _ensemble_head_kernel(x_ref, w_ref, b_ref, o_ref):
    """One (image, pixel-tile) grid point.

    x_ref : (1, C_in, TP)   pixel tile of one image (native NCHW layout)
    w_ref : (C_out, C_in)   ensemble-mean weights (1/M folded in), resident
    b_ref : (C_out, 1)      ensemble-mean bias, resident
    o_ref : (1, C_out, TP)  ensemble-mean prediction tile (lane-dense)
    """
    acc = jnp.dot(w_ref[...], x_ref[0], preferred_element_type=jnp.float32)
    o_ref[0] = (acc + b_ref[...]).astype(o_ref.dtype)


def _vmem_budget_bytes(fraction=0.75):
    """Generation-aware VMEM budget (~48 MiB on v7x, ~96 MiB on v5e/v6e)."""
    try:
        cap = pltpu.get_tpu_info().vmem_capacity_bytes
    except Exception:  # no TPU info available -> conservative v7x-safe default
        cap = 64 * 1024 * 1024
    return int(cap * fraction)


def divergent_nets_forward(x_nchw, weights, biases, *, out_dtype=None,
                           vmem_fraction=0.75):
    """x_nchw: (N, C_in, H, W); weights: (M, C_in, C_out); biases: (M, C_out).

    Returns the ensemble-mean prediction, shape (N, C_out, H, W), matching
    torch.mean(stack([model(x) for model in model_list]), dim=0).
    """
    n, c_in, h, w = x_nchw.shape
    num_models, _, c_out = weights.shape
    hw = h * w
    if out_dtype is None:
        out_dtype = x_nchw.dtype

    # NCHW per image is already (C_in, H*W): free reshape, no activation moves.
    x_rows = x_nchw.reshape(n, c_in, hw)

    # Fold the ensemble: mean_m(W_m^T x + b_m) == mean_m(W_m)^T x + mean_m(b_m)
    # (exact for these linear 1x1 heads).  Only tiny static params are touched.
    w_mean_t = jnp.mean(weights.astype(jnp.float32), axis=0).T          # (C_out, C_in)
    b_mean = jnp.mean(biases.astype(jnp.float32), axis=0).reshape(c_out, 1)

    # --- pixel-tile size from the VMEM budget (kernel is HBM/step-overhead
    # bound: amortize the ~0.35 us per-grid-step cost with the biggest tile
    # that double-buffers within scoped VMEM on this generation). ---
    budget = _vmem_budget_bytes(vmem_fraction)
    in_bytes = jnp.dtype(x_rows.dtype).itemsize
    out_bytes = jnp.dtype(out_dtype).itemsize
    per_pixel = 2 * (c_in * in_bytes + c_out * out_bytes)   # 2x = double buffer
    tp_cap = max(128, (budget // per_pixel // 128) * 128)
    tp = hw if hw <= tp_cap else tp_cap                     # full row or x128 tile

    # v7x megacore: keep >= 2 parallel grid steps so both TensorCores get work.
    if n * (-(-hw // tp)) < 2 and hw > 128:
        tp = min(tp, max(128, ((-(-hw // 2)) + 127) // 128 * 128))

    grid = (n, pl.cdiv(hw, tp))

    out_rows = pl.pallas_call(
        _ensemble_head_kernel,
        out_shape=jax.ShapeDtypeStruct((n, c_out, hw), out_dtype),
        grid=grid,
        in_specs=[
            pl.BlockSpec((1, c_in, tp), lambda i, p: (i, 0, p)),   # x tile
            pl.BlockSpec((c_out, c_in), lambda i, p: (0, 0)),      # W_mean^T (resident)
            pl.BlockSpec((c_out, 1), lambda i, p: (0, 0)),         # b_mean (resident)
        ],
        out_specs=pl.BlockSpec((1, c_out, tp), lambda i, p: (i, 0, p)),  # lane-dense
        compiler_params=pltpu.CompilerParams(
            # Both axes independent -> megacore sharding on v7x (2 TCs/chip).
            dimension_semantics=("parallel", "parallel"),
            vmem_limit_bytes=budget,
        ),
    )(x_rows, w_mean_t, b_mean)

    # (N, C_out, H*W) -> (N, C_out, H, W): free reshape, already NCHW.
    return out_rows.reshape(n, c_out, h, w)


def _reference(x_nchw, weights, biases):
    """Pure-JAX reference of the ensemble forward (per-model, then mean)."""
    outs = [
        jnp.einsum("nchw,co->nohw", x_nchw, weights[m])
        + biases[m][None, :, None, None]
        for m in range(weights.shape[0])
    ]
    return jnp.mean(jnp.stack(outs, axis=0), axis=0)


if __name__ == "__main__":
    key = jax.random.PRNGKey(0)
    k_x, k_w, k_b = jax.random.split(key, 3)

    N, C_IN, H, W = 2, 4, 16, 16
    C_OUT = 4          # number of segmentation classes
    NUM_MODELS = 3     # ensemble size (len(model_list))

    x = jax.random.normal(k_x, (N, C_IN, H, W), dtype=jnp.float32)
    weights = jax.random.normal(k_w, (NUM_MODELS, C_IN, C_OUT), dtype=jnp.float32) * 0.1
    biases = jax.random.normal(k_b, (NUM_MODELS, C_OUT), dtype=jnp.float32) * 0.1

    out = jax.block_until_ready(divergent_nets_forward(x, weights, biases))

    ref = _reference(x, weights, biases)
    assert out.shape == (N, C_OUT, H, W), out.shape
    assert jnp.allclose(out, ref, atol=1e-5, rtol=1e-5), "mismatch vs reference"

    print("KERNEL_OK")
</pallas_src>

<mosaic_0001>
module attributes {stable_mosaic.version = 11 : i64} {
  func.func @_ensemble_head_kernel(%arg0: i32, %arg1: i32, %arg2: memref<1x4x256xf32, #tpu.memory_space<vmem>>, %arg3: memref<4x4xf32, #tpu.memory_space<vmem>>, %arg4: memref<4x1xf32, #tpu.memory_space<vmem>>, %arg5: memref<1x4x256xf32, #tpu.memory_space<vmem>>) attributes {dimension_semantics = [#tpu.dimension_semantics<parallel>, #tpu.dimension_semantics<parallel>], iteration_bounds = array<i64: 2, 1>, scalar_prefetch = 0 : i64, scratch_operands = 0 : i64, tpu.core_type = #tpu.core_type<tc>, window_params = [{transform_indices = @transform_0, window_bounds = array<i64: 1, 4, 256>}, {pipeline_mode = #tpu.pipeline_mode<synchronous>, transform_indices = @transform_1, window_bounds = array<i64: 4, 4>}, {pipeline_mode = #tpu.pipeline_mode<synchronous>, transform_indices = @transform_2, window_bounds = array<i64: 4, 1>}, {transform_indices = @transform_3, window_bounds = array<i64: 1, 4, 256>}]} {
    %c0 = arith.constant 0 : index
    %c0_0 = arith.constant 0 : index
    %0 = vector.load %arg3[%c0, %c0_0] : memref<4x4xf32, #tpu.memory_space<vmem>>, vector<4x4xf32>
    %c0_1 = arith.constant 0 : index
    %c0_2 = arith.constant 0 : index
    %c0_3 = arith.constant 0 : index
    %1 = vector.load %arg2[%c0_1, %c0_2, %c0_3] : memref<1x4x256xf32, #tpu.memory_space<vmem>>, vector<1x4x256xf32>
    %2 = vector.shape_cast %1 : vector<1x4x256xf32> to vector<4x256xf32>
    %cst = arith.constant dense<0.000000e+00> : vector<4x256xf32>
    %3 = tpu.matmul %0, %2, %cst {dimension_numbers = #tpu.dot_dimension_numbers<[1], [0], [0], [1], [0, 0, 1, 1], [], []>} : vector<4x4xf32>, vector<4x256xf32>, vector<4x256xf32> -> vector<4x256xf32>
    %c0_4 = arith.constant 0 : index
    %c0_5 = arith.constant 0 : index
    %4 = vector.load %arg4[%c0_4, %c0_5] : memref<4x1xf32, #tpu.memory_space<vmem>>, vector<4x1xf32>
    %5 = vector.broadcast %4 : vector<4x1xf32> to vector<4x256xf32>
    %6 = arith.addf %3, %5 : vector<4x256xf32>
    %c0_6 = arith.constant 0 : index
    %c0_7 = arith.constant 0 : index
    %c0_8 = arith.constant 0 : index
    %7 = vector.load %arg5[%c0_6, %c0_7, %c0_8] : memref<1x4x256xf32, #tpu.memory_space<vmem>>, vector<1x4x256xf32>
    %8 = vector.shape_cast %7 : vector<1x4x256xf32> to vector<4x256xf32>
    %9 = vector.shape_cast %6 : vector<4x256xf32> to vector<1x4x256xf32>
    tpu.vector_store %arg5[%c0_6, %c0_7, %c0_8], %9 {strides = array<i32>} : memref<1x4x256xf32, #tpu.memory_space<vmem>>, vector<1x4x256xf32>,
    return
  }
  func.func @transform_0(%arg0: i32, %arg1: i32) -> (i32, i32, i32) {
    %c0_i32 = arith.constant 0 : i32
    %c0_i32_0 = arith.constant 0 : i32
    return %arg0, %c0_i32, %arg1 : i32, i32, i32
  }
  func.func @transform_1(%arg0: i32, %arg1: i32) -> (i32, i32) {
    %c0_i32 = arith.constant 0 : i32
    %c0_i32_0 = arith.constant 0 : i32
    %c0_i32_1 = arith.constant 0 : i32
    return %c0_i32, %c0_i32_0 : i32, i32
  }
  func.func @transform_2(%arg0: i32, %arg1: i32) -> (i32, i32) {
    %c0_i32 = arith.constant 0 : i32
    %c0_i32_0 = arith.constant 0 : i32
    %c0_i32_1 = arith.constant 0 : i32
    return %c0_i32, %c0_i32_0 : i32, i32
  }
  func.func @transform_3(%arg0: i32, %arg1: i32) -> (i32, i32, i32) {
    %c0_i32 = arith.constant 0 : i32
    %c0_i32_0 = arith.constant 0 : i32
    return %arg0, %c0_i32, %arg1 : i32, i32, i32
  }
}

</mosaic_0001>

<bundles_post_ra>
// kernel: tpu_custom_call.1
= control target key start
LH: loop header
LB: loop body
LE: loop exit
PB: predicated region body
PF: predicated region fallthrough
CT: control target
= control target key end

     0   :  { %8 = vsyncpa [#allocation3], 0  ;;  %s763_s0 = inlined_call_operand.hbm [shape: f32[2,4,256], index: 0, kind: input, shape index: {}]   ;;  %s764_s1 = inlined_call_operand.vmem [shape: f32[4,4], index: 1, kind: input, shape index: {}]   ;;  %s765_s2 = inlined_call_operand.vmem [shape: f32[4,1], index: 2, kind: input, shape index: {}]   ;;  %s766_s3 = inlined_call_operand.hbm [shape: f32[2,4,256], index: 3, kind: output, shape index: {}]  }
   0x1   :  { %10 = vsyncpa [#allocation3 + $0x1], 0 }
   0x2   :  { %11 = vsyncpa [#allocation4], 0 }
   0x3   :  { %13 = vsyncpa [#allocation4 + $0x1], 0  ;;  %s623_s12 = smov 0   ;;  %s625_s13 = smov 0  }
   0x4   :  { %s627_s14 = smov 0   ;;  %s629_s15 = smov 0  }
   0x5   :  { %s631_s16 = smov 0   ;;  %s633_s17 = smov 0  }
   0x6 LB: > { %s403_s18 = sadd.s32 4294967295, %s597_s17   ;;  %s404_s19 = sadd.s32 4294967294, %s597_s17   ;;  %s597_s17 = sphi %s633_s17, %s19_s17   ;;  %s593_s16 = sphi %s631_s16, %s778_s16   ;;  %s589_s15 = sphi %s629_s15, %s777_s15   ;;  %s585_s14 = sphi %s627_s14, %s776_s14   ;;  %s581_s13 = sphi %s625_s13, %s775_s13   ;;  %s577_s12 = sphi %s623_s12, %s774_s12  }
   0x7   : > { %s31_s20 = sadd.s32 1, %s593_s16  ;;  %s40_s21 = sadd.s32 1, %s585_s14 }
   0x8   : > { %p33_p0 = scmp.ge.s32.totalorder %s31_s20, 2  ;;  %p47_p1 = scmp.ne.s32.totalorder %s585_s14, %s581_s13 }
   0x9   : > { %p48_p2 = scmp.eq.s32.totalorder %s597_s17, 0  ;;  %p53_p3 = scmp.ne.s32.totalorder %s581_s13, %s577_s12 }
   0xa   : > { %s780_s20 = smov (%p33_p0, %s31_s20), 0  ;;  %p54_p5 = scmp.eq.s32.totalorder %s403_s18, 0 }
   0xb   : > { %p664_p4 = por %p48_p2, %p47_p1  ;;  %s35_s23 = ssub.s32 %s593_s16, %s780_s20 }
   0xc   : > { %p121_p6 = scmp.eq.s32.totalorder %s403_s18, 1  ;;  %p38_p7 = scmp.eq.s32.totalorder %s35_s23, 0 }
   0xd   : > { %p670_p8 = por %p54_p5, %p53_p3  ;;  %p127_p10 = scmp.eq.s32.totalorder %s404_s19, 1 }
   0xe   : > { %p674_p9 = por %p121_p6, %p47_p1  ;;  %p435_p13 = scmp.lt.s32.totalorder %s597_s17, 2 }
   0xf   : > { %s679_s26 = scalar_select %p38_p7, %s585_s14, %s40_s21  }
  0x10   : > { %p681_p11 = por %p127_p10, %p53_p3  ;;  %s153_s28 = sand.u32 1, %s585_s14  }
  0x11   : > { %s407_s29 = sshll.u32 %s153_s28, 3  ;;  %s421_s30 = sshll.u32 %s593_s16, 7 }
  0x12   : > { %s770_s27 = scalar_select %p681_p11, 1, 0 }
  0x13   : > { %s165_s6 = scalar_lea.hbm %s763_s0, %s421_s30  ;;  %s157_s7 = scalar_lea.vmem [#allocation2], %s407_s29 }
  0x14   : > { %s167_s8 = sshll.u32 %s157_s7, 4  ;;  %p694_p0 = pnand %p435_p13, %p664_p4  ;;  %s168_s8 = int_to_ptr.vmem [resolvable:$true] %s167_s8 }
  0x15   : > { %p410_p1 = scmp.ge.s32.totalorder %s597_s17, 1  ;;  %p172_p2 = scmp.lt.s32.totalorder %s597_s17, 3 }
  0x16   : > { %s154_s10 = scalar_lea.sflag [#allocation3], %s153_s28  ;;  %p491_p3 = pneg %p694_p0 }
  0x17   : > { %s502_s11 = scalar_lea.vmem %s168_s8, 128  ;;  %s599_s18 = smov [#allocation2]  }
  0x18   : > { %p503_p5 = scmp.ne.s32.totalorder %s168_s8, %s502_s11  ;;  %s507_s19 = sshll.u32 %s599_s18, 4  ;;  %s508_s19 = int_to_ptr.vmem [resolvable:$false] %s507_s19 }
  0x19   : > { %s509_s21 = scalar_lea.vmem %s508_s19, 256  ;;  %p510_p10 = scmp.lt.s32.totalorder %s168_s8, %s508_s19 }
  0x1a   : > { %p505_p6 = pnand %p503_p5, %p491_p3  ;;  %p511_p12 = scmp.lt.s32.totalorder %s509_s21, %s502_s11 }
  0x1c   : > { %p506_p7 = pneg %p505_p6  ;;  %p512_p4 = por %p511_p12, %p510_p10 }
  0x1e   : > { %p513_p13 = pnand %p512_p4, %p506_p7 }
  0x20   : > { %516 = shalt.err (!%p513_p13)
}
  0x21   : > { %430 = dma.hbm_to_vmem [thread:$0]  (!%p694_p0), %s165_s6, 128, %s168_s8, %s154_s10  }
  0x22   : > { %p173_p11 = pnand %p410_p1, %p172_p2 }
  0x23   : > { %s709_s22 = sand.u32 (!%p173_p11), 1, %s581_s13  }
  0x24   : > { %176 = sbr.rel (%p173_p11) target bundleno = 259 (0x103), region = 32  ;;  %s411_s23 = sshll.u32 (!%p173_p11), %s709_s22, 3 }
  0x25   : > { %s179_s28 = scalar_lea.sflag (!%p173_p11), [#allocation3], %s709_s22  ;;  %s182_s29 = scalar_lea.vmem (!%p173_p11), [#allocation2], %s411_s23 }
  0x29   : > { %568 = dma.done.wait (%p670_p8), %s179_s28, 128  }
  0x2a   : > { %570 = vsyncadd (%p670_p8), %s179_s28, 4294967168  ;;  %v600_v0 = vmov 0.0   ;;  %v601_v1 = vmov 0   ;;  %v208_v2 = vld [vmem:[%s182_s29] sm:$0xff]  ;;  %vm221_vm0 = vcmask 1043456   ;;  %vm217_vm1 = vcmask 31744  }
  0x2b   : > { %290 = vmatprep.mubr.f32.mxu0 %v600_v0  ;;  %487 = vset.pattern.permute.xlu0 %v601_v1  ;;  %v209_v3 = vld [vmem:[%s765_s2] sm:$0xf]  ;;  %v216_v4 = vcombine.high %v208_v2, %v208_v2  ;;  %s422_s24 = sshll.u32 %s589_s15, 7  ;;  %s204_s7 = scalar_lea.vmem [#allocation5], %s411_s23 }
  0x2c   : > { %212 = vperm.xlu0 %487, %v209_v3   ;;  %v207_v5 = vld [vmem:[%s764_s1] sm:$0xf]  ;;  %s319_s8 = sshll.u32 %s204_s7, 4  ;;  %s317_s11 = scalar_lea.hbm %s766_s3, %s422_s24  ;;  %s320_s8 = int_to_ptr.vmem [resolvable:$true] %s319_s8 }
  0x2d   : > { %413 = vmatprep.subr.msk.mxu0 %vm221_vm0, %v216_v4  ;;  %s303_s18 = scalar_lea.sflag [#allocation4], %s709_s22  ;;  %s517_s19 = scalar_lea.vmem %s320_s8, 128 }
  0x2e   : > { %414 = vmatpush1.msk.msra.mxu0 %vm221_vm0, %v208_v2  ;;  %p518_p8 = scmp.ne.s32.totalorder %s320_s8, %s517_s19  ;;  %s602_s21 = smov [#allocation5]  }
  0x2f   : > { %415 = vmatmul.mubr.msk.f32.vlgmr.msra.gmra.mxu0 %vm217_vm1, %v207_v5  ;;  %s521_s28 = sshll.u32 %s602_s21, 4  ;;  %s522_s28 = int_to_ptr.vmem [resolvable:$false] %s521_s28 }
  0x30   : > { %p519_p11 = pnand %p518_p8, %p674_p9  ;;  %s523_s15 = scalar_lea.vmem %s522_s28, 256 }
  0x31   : > { %p524_p0 = scmp.lt.s32.totalorder %s320_s8, %s522_s28  ;;  %p525_p1 = scmp.lt.s32.totalorder %s523_s15, %s517_s19 }
  0x32   : > { %p520_p12 = pneg %p519_p11 }
  0x33   : > { %p526_p2 = por %p525_p1, %p524_p0 }
  0x35   : > { %p527_p3 = pnand %p526_p2, %p520_p12 }
  0xa7   : > { %v213_v6 = vpop.permute.xlu0 %212 }
  0xef   : > { %v292_v7 = vpop.f32.mrf.mxu0 }
  0xf0   : > { %v293_v9 = vadd.f32 %v292_v7, %v213_v6 }
  0xf1   : > { %v294_v8 = vpop.f32.mrf.mxu0 }
  0xf2   : > { %v295_v10 = vadd.f32 %v294_v8, %v213_v6 }
  0xf4   : > { %v299_v11 = vcombine.low %v293_v9, %v295_v10 }
  0xf6   : > { %301 = vst [vmem:[%s204_s7] sm:$0xff] %v299_v11 }
  0xf7   : > { %530 = shalt.err (!%p527_p3)
}
  0xf8   : > { %s531_s23 = scalar_lea.hbm %s317_s11, 128  ;;  %s535_s30 = scalar_lea.hbm %s766_s3, 256 }
  0xf9   : > { %p532_p5 = scmp.ne.s32.totalorder %s317_s11, %s531_s23  ;;  %p536_p10 = scmp.lt.s32.totalorder %s317_s11, %s766_s3 }
  0xfa   : > { %p537_p4 = scmp.lt.s32.totalorder %s535_s30, %s531_s23 }
  0xfb   : > { %p533_p6 = pnand %p532_p5, %p674_p9 }
  0xfc   : > { %p538_p13 = por %p537_p4, %p536_p10 }
  0xfd   : > { %p534_p7 = pneg %p533_p6 }
  0xff   : > { %p539_p8 = pnand %p538_p13, %p534_p7 }
 0x101   : > { %542 = shalt.err (!%p539_p8)
}
 0x102   : > { %425 = dma.vmem_to_hbm [thread:$0]  (%p674_p9), %s320_s8, 128, %s317_s11, %s303_s18  }
 0x103 PF: > { %s331_s6 = sand.u32 1, %s577_s12   ;;  %p772_p11 = scmp.ne.s32.totalorder %s770_s27, 0 }
 0x104   : > { %p773_p12 = scmp.ge.s32.totalorder %s597_s17, 2  ;;  %s332_s24 = scalar_lea.sflag [#allocation4], %s331_s6 }
 0x106   : > { %p432_p0 = pnand %p773_p12, %p772_p11 }
 0x108   : > { %p433_p1 = pneg %p432_p0 }
 0x10a   : > { %572 = dma.done.wait (%p433_p1), %s332_s24, 128  }
 0x10b   : > { %574 = vsyncadd (%p433_p1), %s332_s24, 4294967168  ;;  %s19_s17 = sadd.s32 1, %s597_s17   ;;  %s774_s12 = smov %s581_s13 }
 0x10c   : > { %p16_p2 = scmp.ge.s32.totalorder %s19_s17, 4   ;;  %s775_s13 = smov %s585_s14 }
 0x10d   : > { %s776_s14 = smov %s679_s26  ;;  %s777_s15 = smov %s593_s16 }
 0x10e   : > { %s778_s16 = smov %s780_s20  ;;  %18 = sbr.rel (!%p16_p2) target bundleno = 6 (0x6), region = 77 }
 0x113   :  { %337 = vsyncpa [#allocation3], 1 }
 0x114   :  { %339 = vsyncpa [#allocation3 + $0x1], 1 }
 0x115   :  { %340 = vsyncpa [#allocation4], 1 }
 0x116   :  { %342 = vsyncpa [#allocation4 + $0x1], 1 }

</bundles_post_ra>
